<compile_context>
chip_gen: v5e
topology: v5e:2x2
jax: 0.10.0
libtpu: 0.0.40
codegen_flags: <defaults>
</compile_context>

<pallas_src>
import jax
import jax.numpy as jnp
from jax.experimental import pallas as pl
from jax.experimental.pallas import tpu as pltpu


# ----------------------------------------------------------------------------
# In-kernel helpers
# ----------------------------------------------------------------------------
def _mm_bias(x, wb, act=True):
    """y = x @ wb[:-1] + wb[-1]; bf16 MXU operands, f32 accumulation, optional ReLU.

    `wb` packs the (K, N) weight and the (N,) bias as one (K+1, N) array (bias is
    the last row) so each layer is a single VMEM operand."""
    w = wb[:-1, :].astype(jnp.bfloat16)
    b = wb[-1:, :].astype(jnp.float32)
    y = jnp.dot(x.astype(jnp.bfloat16), w, preferred_element_type=jnp.float32) + b
    return jnp.maximum(y, 0.0) if act else y


def _rank2_linear_relu(x2, wb):
    """relu(x2 @ wb[:-1] + wb[-1]) for contraction depth K in {1, 2}, done on the
    VPU as broadcast outer-products instead of a degenerate-K MXU matmul."""
    k = wb.shape[0] - 1
    acc = wb[k:k + 1, :]                              # bias row (1, N)
    for f in range(k):
        acc = acc + x2[:, f:f + 1] * wb[f:f + 1, :]   # (R,1)*(1,N) broadcast
    return jnp.maximum(acc, 0.0)


# ----------------------------------------------------------------------------
# K1: TokenEmbedKnapsack
# ----------------------------------------------------------------------------
def _token_embed_kernel(o_ref, c_ref, w1p_ref, wc1p_ref, w2catp_ref, out_ref):
    # o_ref:     (n_val, tr, 2) f32   per-value tokens [value, position-id] for tr rows
    # c_ref:     (tr, 2)       f32    weight/constraint features
    # w1p_ref:   (3, 2D)       f32    [W1 row0; W1 row1; b1]
    # wc1p_ref:  (3, 2D)       f32    [Wc1 row0; Wc1 row1; bc1]
    # w2catp_ref:(4D+1, 2D)    bf16   block-diag(W2, Wc2) with fused bias row
    # out_ref:   (tr, D)       f32
    n_val = o_ref.shape[0]
    w1p = w1p_ref[...]
    d2 = w1p.shape[1]
    tr = c_ref.shape[0]

    # linear1 + relu on every (value, row) token, reduced over the value axis (VPU).
    hsum = jnp.zeros((tr, d2), jnp.float32)
    for v in range(n_val):                            # small static loop
        hsum = hsum + _rank2_linear_relu(o_ref[v], w1p)

    # c-path first layer (K = 2, VPU).
    hc = _rank2_linear_relu(c_ref[...], wc1p_ref[...])

    # Fused second linears: one K = 4D MXU matmul (block-diagonal weights), then
    # split + add == relu(hsum @ W2 + b2) + relu(hc @ Wc2 + bc2).
    x = jnp.concatenate([hsum, hc], axis=-1)          # (tr, 4D)
    y = _mm_bias(x, w2catp_ref[...], act=True)        # (tr, 2D)
    d = y.shape[1] // 2
    out_ref[...] = (y[:, :d] + y[:, d:]).astype(out_ref.dtype)


# ----------------------------------------------------------------------------
# K2: heads (instance / layer-index / variable embeddings + aggregator + predictor)
# ----------------------------------------------------------------------------
def _head_kernel(vids_ref,                            # scalar prefetch: (B,) int32 in SMEM
                 lids_ref, nemb_ref, states_ref,
                 wi1p_ref, wi2p_ref, wl1p_ref, wl2p_ref,
                 wa1p_ref, wa2p_ref, wpp_ref,
                 out_ref):
    B, ts, _ = states_ref.shape
    D = nemb_ref.shape[1]
    L = nemb_ref.shape[0] // B

    nb = nemb_ref[...]                                # (B*L, D) f32

    # ---- instance embedding: instance_encoder(n_emb.sum(1)) ----
    inst_sum = nb.reshape(B, L, D).sum(axis=1)        # (B, D)
    inst = _mm_bias(_mm_bias(inst_sum, wi1p_ref[...]), wi2p_ref[...])

    # ---- layer-index embedding: MLP(1, D, D) ----
    li_h = _rank2_linear_relu(lids_ref[...], wl1p_ref[...])    # (B, D)
    li = _mm_bias(li_h, wl2p_ref[...])                         # (B, D)

    # ---- variable embedding: n_emb[b, vids[b]] as a dynamic row slice (no one-hot) ----
    rows = []
    for b in range(B):                                # small static loop
        r = b * L + vids_ref[b]
        rows.append(nemb_ref[pl.ds(r, 1), :])         # (1, D)
    lv = jnp.concatenate(rows, axis=0)                # (B, D)

    base = inst + li + lv                             # (B, D)

    # ---- state aggregation + residual + predictor ----
    st = states_ref[...].reshape(B * ts, 1)
    ah = _rank2_linear_relu(st, wa1p_ref[...])        # (B*ts, 2D)  (K=1 on VPU)
    ag = _mm_bias(ah, wa2p_ref[...])                  # (B*ts, D)
    e = ag.reshape(B, ts, D) + base[:, None, :]       # (B, ts, D)
    logits = _mm_bias(e.reshape(B * ts, D), wpp_ref[...], act=False)   # (B*ts, 2)
    out_ref[...] = logits.reshape(B, ts, 2).astype(out_ref.dtype)


# ----------------------------------------------------------------------------
# Wrapper
# ----------------------------------------------------------------------------
def pareto_state_predictor_knapsack(n_feat, lids, vids, states, params,
                                    max_objs=10.0, row_tile=256, state_tile=256):
    B, L, cp2 = n_feat.shape
    C = cp2 - 2
    D = params["w2"].shape[1]
    D2 = 2 * D
    S = states.shape[1]
    R = B * L

    # ---------------- tokenizer (pure layout, wrapper-side) ----------------
    objs = n_feat[:, :, :C]                                       # (B, L, C)
    w_feat = n_feat[:, :, C:]                                     # (B, L, 2)
    pos_id = jnp.arange(1, L + 1, dtype=jnp.float32) / max_objs   # (L,)
    o_vals = jnp.transpose(objs, (2, 0, 1)).reshape(C, R)         # (C, B*L)
    o_ids = jnp.broadcast_to(pos_id[None, None, :], (C, B, L)).reshape(C, R)
    o = jnp.stack([o_vals, o_ids], axis=-1)                       # (C, B*L, 2)
    c = w_feat.reshape(R, 2)

    # ---------------- weight packing (bias folded as last row) ----------------
    def pack(w, b):
        return jnp.concatenate([w, b[None, :]], axis=0)

    w1p = pack(params["w1"], params["b1"])                        # (3, 2D)  f32
    wc1p = pack(params["wc1"], params["bc1"])                     # (3, 2D)  f32
    w2cat = jnp.zeros((2 * D2, D2), jnp.float32)
    w2cat = w2cat.at[:D2, :D].set(params["w2"])
    w2cat = w2cat.at[D2:, D:].set(params["wc2"])
    b2cat = jnp.concatenate([params["b2"], params["bc2"]])
    w2catp = pack(w2cat, b2cat).astype(jnp.bfloat16)              # (4D+1, 2D) bf16

    # ---------------- K1: token embedding, tiled over B*L rows ----------------
    tr = row_tile if (row_tile <= R and R % row_tile == 0) else R
    k1_cost = pl.CostEstimate(
        flops=int(2 * R * (C + 1) * 2 * D2 + 2 * R * (2 * D2) * D2),
        transcendentals=0,
        bytes_accessed=int(o.size * 4 + c.size * 4 + w1p.size * 4 + wc1p.size * 4
                           + w2catp.size * 2 + R * D * 4))
    n_emb = pl.pallas_call(
        _token_embed_kernel,
        out_shape=jax.ShapeDtypeStruct((R, D), jnp.float32),
        grid=(R // tr,),
        in_specs=[
            pl.BlockSpec((C, tr, 2), lambda i: (0, i, 0)),        # o
            pl.BlockSpec((tr, 2), lambda i: (i, 0)),              # c
            pl.BlockSpec((3, D2), lambda i: (0, 0)),              # w1 + b1
            pl.BlockSpec((3, D2), lambda i: (0, 0)),              # wc1 + bc1
            pl.BlockSpec((2 * D2 + 1, D2), lambda i: (0, 0)),     # fused W2/Wc2 + bias
        ],
        out_specs=pl.BlockSpec((tr, D), lambda i: (i, 0)),
        compiler_params=pltpu.CompilerParams(dimension_semantics=("parallel",)),
        cost_estimate=k1_cost,
    )(o, c, w1p, wc1p, w2catp)

    # TODO(synk): self.encoder = get_encoder('transformer', ...) is not defined in the
    # provided module source; it is treated as the identity map here.

    # ---------------- K2: heads + aggregator + predictor, tiled over states ----------------
    vids_i32 = vids.astype(jnp.int32).reshape(B)
    lids_2d = lids.reshape(B, 1).astype(jnp.float32)

    wi1p = pack(params["wi1"], params["bi1"]).astype(jnp.bfloat16)   # (D+1, 2D)
    wi2p = pack(params["wi2"], params["bi2"]).astype(jnp.bfloat16)   # (2D+1, D)
    wl1p = pack(params["wl1"], params["bl1"])                        # (2, D)   f32 (VPU)
    wl2p = pack(params["wl2"], params["bl2"]).astype(jnp.bfloat16)   # (D+1, D)
    wa1p = pack(params["wa1"], params["ba1"])                        # (2, 2D)  f32 (VPU)
    wa2p = pack(params["wa2"], params["ba2"]).astype(jnp.bfloat16)   # (2D+1, D)
    wpp = pack(params["wp"], params["bp"]).astype(jnp.bfloat16)      # (D+1, 2)

    ts = state_tile if (state_tile <= S and S % state_tile == 0) else S
    k2_cost = pl.CostEstimate(
        flops=int(2 * B * S * (D2 + D2 * D + 2 * D)
                  + 2 * B * (D * D2 + D2 * D + D * D)),
        transcendentals=0,
        bytes_accessed=int(states.size * 4 + n_emb.size * 4 + B * S * 2 * 4))

    logits = pl.pallas_call(
        _head_kernel,
        out_shape=jax.ShapeDtypeStruct((B, S, 2), jnp.float32),
        grid_spec=pltpu.PrefetchScalarGridSpec(
            num_scalar_prefetch=1,                                   # vids -> SMEM
            grid=(S // ts,),
            in_specs=[
                pl.BlockSpec((B, 1), lambda s, vids: (0, 0)),        # lids
                pl.BlockSpec((R, D), lambda s, vids: (0, 0)),        # n_emb
                pl.BlockSpec((B, ts, 1), lambda s, vids: (0, s, 0)), # states tile
                pl.BlockSpec((D + 1, D2), lambda s, vids: (0, 0)),   # wi1p
                pl.BlockSpec((D2 + 1, D), lambda s, vids: (0, 0)),   # wi2p
                pl.BlockSpec((2, D), lambda s, vids: (0, 0)),        # wl1p
                pl.BlockSpec((D + 1, D), lambda s, vids: (0, 0)),    # wl2p
                pl.BlockSpec((2, D2), lambda s, vids: (0, 0)),       # wa1p
                pl.BlockSpec((D2 + 1, D), lambda s, vids: (0, 0)),   # wa2p
                pl.BlockSpec((D + 1, 2), lambda s, vids: (0, 0)),    # wpp
            ],
            out_specs=pl.BlockSpec((B, ts, 2), lambda s, vids: (0, s, 0)),
        ),
        compiler_params=pltpu.CompilerParams(dimension_semantics=("parallel",)),
        cost_estimate=k2_cost,
    )(vids_i32, lids_2d, n_emb, states.astype(jnp.float32),
      wi1p, wi2p, wl1p, wl2p, wa1p, wa2p, wpp)

    return logits


# ----------------------------------------------------------------------------
# Deterministic parameters + pure-JAX fp32 reference + test harness
# ----------------------------------------------------------------------------
def make_params(key, d_emb):
    D, D2 = d_emb, 2 * d_emb
    shapes = {
        "w1": (2, D2), "b1": (D2,),          # token linear1
        "w2": (D2, D), "b2": (D,),           # token linear2
        "wc1": (2, D2), "bc1": (D2,),        # token mlp (c path) linear1
        "wc2": (D2, D), "bc2": (D,),         # token mlp (c path) linear2
        "wi1": (D, D2), "bi1": (D2,),        # instance encoder
        "wi2": (D2, D), "bi2": (D,),
        "wl1": (1, D), "bl1": (D,),          # layer-index encoder
        "wl2": (D, D), "bl2": (D,),
        "wa1": (1, D2), "ba1": (D2,),        # aggregator
        "wa2": (D2, D), "ba2": (D,),
        "wp": (D, 2), "bp": (2,),            # predictor
    }
    keys = jax.random.split(key, len(shapes))
    return {name: 0.1 * jax.random.normal(k, shp, jnp.float32)
            for (name, shp), k in zip(shapes.items(), keys)}


def _mlp_ref(x, w1, b1, w2, b2):
    h = jax.nn.relu(x @ w1 + b1)
    return jax.nn.relu(h @ w2 + b2)


def reference_forward(n_feat, lids, vids, states, params, max_objs=10.0):
    objs = n_feat[:, :, :-2]
    weight = n_feat[:, :, -2:]
    B, A, C = objs.shape
    ids = jnp.arange(1, A + 1, dtype=jnp.float32) / max_objs
    ids = jnp.broadcast_to(ids[None, None, :], (B, C, A))
    o = jnp.concatenate([jnp.transpose(objs, (0, 2, 1))[..., None], ids[..., None]],
                        axis=-1)                                    # (B, C, A, 2)
    # TokenEmbedKnapsack
    h1 = jax.nn.relu(o @ params["w1"] + params["b1"])
    hsum = h1.sum(axis=1)
    o2 = jax.nn.relu(hsum @ params["w2"] + params["b2"])
    cc = _mlp_ref(weight, params["wc1"], params["bc1"], params["wc2"], params["bc2"])
    n_emb = o2 + cc                                                 # (B, A, D)
    # encoder: identity (matches TODO in the Pallas wrapper)
    inst = _mlp_ref(n_emb.sum(axis=1), params["wi1"], params["bi1"],
                    params["wi2"], params["bi2"])
    li = _mlp_ref(lids.reshape(B, 1), params["wl1"], params["bl1"],
                  params["wl2"], params["bl2"])
    lv = n_emb[jnp.arange(B), vids.astype(jnp.int32)]
    st = _mlp_ref(states, params["wa1"], params["ba1"], params["wa2"], params["ba2"])
    st = st + (inst + li + lv)[:, None, :]
    return st @ params["wp"] + params["bp"]


if __name__ == "__main__":
    # Small shapes: batch=2, tokens=8, values-per-token=4, d_emb=32, states=16.
    B, L, C = 2, 8, 4
    D = 32
    S = 16
    max_objs = 10.0

    key = jax.random.PRNGKey(0)
    kn, kl, kv, ks, kw = jax.random.split(key, 5)
    n_feat = jax.random.normal(kn, (B, L, C + 2), jnp.float32)
    lids = jax.random.uniform(kl, (B, 1), jnp.float32)
    vids = jax.random.randint(kv, (B,), 0, L, jnp.int32)
    states = jax.random.uniform(ks, (B, S, 1), jnp.float32)
    params = make_params(kw, D)

    logits = pareto_state_predictor_knapsack(
        n_feat, lids, vids, states, params,
        max_objs=max_objs, row_tile=8, state_tile=8)
    jax.block_until_ready(logits)

    ref = reference_forward(n_feat, lids, vids, states, params, max_objs=max_objs)
    assert logits.shape == (B, S, 2), logits.shape
    max_err = float(jnp.max(jnp.abs(logits - ref)))
    # bf16 MXU operands (fp32 accumulation) -> mixed-precision tolerance vs fp32 reference.
    assert jnp.allclose(logits, ref, atol=2e-2, rtol=2e-2), max_err
    print("KERNEL_OK")
</pallas_src>

<mosaic_0001>
module attributes {stable_mosaic.version = 11 : i64} {
  func.func @_token_embed_kernel(%arg0: i32, %arg1: memref<4x8x2xf32, #tpu.memory_space<vmem>>, %arg2: memref<8x2xf32, #tpu.memory_space<vmem>>, %arg3: memref<3x64xf32, #tpu.memory_space<vmem>>, %arg4: memref<3x64xf32, #tpu.memory_space<vmem>>, %arg5: memref<129x64xbf16, #tpu.memory_space<vmem>>, %arg6: memref<8x32xf32, #tpu.memory_space<vmem>>) attributes {dimension_semantics = [#tpu.dimension_semantics<parallel>], iteration_bounds = array<i64: 2>, scalar_prefetch = 0 : i64, scratch_operands = 0 : i64, tpu.core_type = #tpu.core_type<tc>, window_params = [{transform_indices = @transform_0, window_bounds = array<i64: 4, 8, 2>}, {transform_indices = @transform_1, window_bounds = array<i64: 8, 2>}, {pipeline_mode = #tpu.pipeline_mode<synchronous>, transform_indices = @transform_2, window_bounds = array<i64: 3, 64>}, {pipeline_mode = #tpu.pipeline_mode<synchronous>, transform_indices = @transform_3, window_bounds = array<i64: 3, 64>}, {pipeline_mode = #tpu.pipeline_mode<synchronous>, transform_indices = @transform_4, window_bounds = array<i64: 129, 64>}, {transform_indices = @transform_5, window_bounds = array<i64: 8, 32>}]} {
    %c0 = arith.constant 0 : index
    %c0_0 = arith.constant 0 : index
    %0 = vector.load %arg3[%c0, %c0_0] : memref<3x64xf32, #tpu.memory_space<vmem>>, vector<3x64xf32>
    %cst = arith.constant 0.000000e+00 : f32
    %1 = vector.broadcast %cst : f32 to vector<8x64xf32>
    %c0_1 = arith.constant 0 : index
    %c0_2 = arith.constant 0 : index
    %c0_3 = arith.constant 0 : index
    %2 = vector.load %arg1[%c0_1, %c0_2, %c0_3] : memref<4x8x2xf32, #tpu.memory_space<vmem>>, vector<1x8x2xf32>
    %3 = vector.shape_cast %2 : vector<1x8x2xf32> to vector<8x2xf32>
    %4 = vector.extract_strided_slice %0 {offsets = [2, 0], sizes = [1, 64], strides = [1, 1]} : vector<3x64xf32> to vector<1x64xf32>
    %5 = vector.extract_strided_slice %3 {offsets = [0, 0], sizes = [8, 1], strides = [1, 1]} : vector<8x2xf32> to vector<8x1xf32>
    %6 = vector.extract_strided_slice %0 {offsets = [0, 0], sizes = [1, 64], strides = [1, 1]} : vector<3x64xf32> to vector<1x64xf32>
    %7 = vector.broadcast %5 : vector<8x1xf32> to vector<8x64xf32>
    %8 = vector.broadcast %6 : vector<1x64xf32> to vector<8x64xf32>
    %9 = arith.mulf %7, %8 : vector<8x64xf32>
    %10 = vector.broadcast %4 : vector<1x64xf32> to vector<8x64xf32>
    %11 = arith.addf %10, %9 : vector<8x64xf32>
    %12 = vector.extract_strided_slice %3 {offsets = [0, 1], sizes = [8, 1], strides = [1, 1]} : vector<8x2xf32> to vector<8x1xf32>
    %13 = vector.extract_strided_slice %0 {offsets = [1, 0], sizes = [1, 64], strides = [1, 1]} : vector<3x64xf32> to vector<1x64xf32>
    %14 = vector.broadcast %12 : vector<8x1xf32> to vector<8x64xf32>
    %15 = vector.broadcast %13 : vector<1x64xf32> to vector<8x64xf32>
    %16 = arith.mulf %14, %15 : vector<8x64xf32>
    %17 = arith.addf %11, %16 : vector<8x64xf32>
    %cst_4 = arith.constant 0.000000e+00 : f32
    %18 = vector.broadcast %cst_4 : f32 to vector<8x64xf32>
    %19 = arith.maximumf %17, %18 : vector<8x64xf32>
    %20 = arith.addf %1, %19 : vector<8x64xf32>
    %c1 = arith.constant 1 : index
    %c0_5 = arith.constant 0 : index
    %c0_6 = arith.constant 0 : index
    %21 = vector.load %arg1[%c1, %c0_5, %c0_6] : memref<4x8x2xf32, #tpu.memory_space<vmem>>, vector<1x8x2xf32>
    %22 = vector.shape_cast %21 : vector<1x8x2xf32> to vector<8x2xf32>
    %23 = vector.extract_strided_slice %0 {offsets = [2, 0], sizes = [1, 64], strides = [1, 1]} : vector<3x64xf32> to vector<1x64xf32>
    %24 = vector.extract_strided_slice %22 {offsets = [0, 0], sizes = [8, 1], strides = [1, 1]} : vector<8x2xf32> to vector<8x1xf32>
    %25 = vector.extract_strided_slice %0 {offsets = [0, 0], sizes = [1, 64], strides = [1, 1]} : vector<3x64xf32> to vector<1x64xf32>
    %26 = vector.broadcast %24 : vector<8x1xf32> to vector<8x64xf32>
    %27 = vector.broadcast %25 : vector<1x64xf32> to vector<8x64xf32>
    %28 = arith.mulf %26, %27 : vector<8x64xf32>
    %29 = vector.broadcast %23 : vector<1x64xf32> to vector<8x64xf32>
    %30 = arith.addf %29, %28 : vector<8x64xf32>
    %31 = vector.extract_strided_slice %22 {offsets = [0, 1], sizes = [8, 1], strides = [1, 1]} : vector<8x2xf32> to vector<8x1xf32>
    %32 = vector.extract_strided_slice %0 {offsets = [1, 0], sizes = [1, 64], strides = [1, 1]} : vector<3x64xf32> to vector<1x64xf32>
    %33 = vector.broadcast %31 : vector<8x1xf32> to vector<8x64xf32>
    %34 = vector.broadcast %32 : vector<1x64xf32> to vector<8x64xf32>
    %35 = arith.mulf %33, %34 : vector<8x64xf32>
    %36 = arith.addf %30, %35 : vector<8x64xf32>
    %cst_7 = arith.constant 0.000000e+00 : f32
    %37 = vector.broadcast %cst_7 : f32 to vector<8x64xf32>
    %38 = arith.maximumf %36, %37 : vector<8x64xf32>
    %39 = arith.addf %20, %38 : vector<8x64xf32>
    %c2 = arith.constant 2 : index
    %c0_8 = arith.constant 0 : index
    %c0_9 = arith.constant 0 : index
    %40 = vector.load %arg1[%c2, %c0_8, %c0_9] : memref<4x8x2xf32, #tpu.memory_space<vmem>>, vector<1x8x2xf32>
    %41 = vector.shape_cast %40 : vector<1x8x2xf32> to vector<8x2xf32>
    %42 = vector.extract_strided_slice %0 {offsets = [2, 0], sizes = [1, 64], strides = [1, 1]} : vector<3x64xf32> to vector<1x64xf32>
    %43 = vector.extract_strided_slice %41 {offsets = [0, 0], sizes = [8, 1], strides = [1, 1]} : vector<8x2xf32> to vector<8x1xf32>
    %44 = vector.extract_strided_slice %0 {offsets = [0, 0], sizes = [1, 64], strides = [1, 1]} : vector<3x64xf32> to vector<1x64xf32>
    %45 = vector.broadcast %43 : vector<8x1xf32> to vector<8x64xf32>
    %46 = vector.broadcast %44 : vector<1x64xf32> to vector<8x64xf32>
    %47 = arith.mulf %45, %46 : vector<8x64xf32>
    %48 = vector.broadcast %42 : vector<1x64xf32> to vector<8x64xf32>
    %49 = arith.addf %48, %47 : vector<8x64xf32>
    %50 = vector.extract_strided_slice %41 {offsets = [0, 1], sizes = [8, 1], strides = [1, 1]} : vector<8x2xf32> to vector<8x1xf32>
    %51 = vector.extract_strided_slice %0 {offsets = [1, 0], sizes = [1, 64], strides = [1, 1]} : vector<3x64xf32> to vector<1x64xf32>
    %52 = vector.broadcast %50 : vector<8x1xf32> to vector<8x64xf32>
    %53 = vector.broadcast %51 : vector<1x64xf32> to vector<8x64xf32>
    %54 = arith.mulf %52, %53 : vector<8x64xf32>
    %55 = arith.addf %49, %54 : vector<8x64xf32>
    %cst_10 = arith.constant 0.000000e+00 : f32
    %56 = vector.broadcast %cst_10 : f32 to vector<8x64xf32>
    %57 = arith.maximumf %55, %56 : vector<8x64xf32>
    %58 = arith.addf %39, %57 : vector<8x64xf32>
    %c3 = arith.constant 3 : index
    %c0_11 = arith.constant 0 : index
    %c0_12 = arith.constant 0 : index
    %59 = vector.load %arg1[%c3, %c0_11, %c0_12] : memref<4x8x2xf32, #tpu.memory_space<vmem>>, vector<1x8x2xf32>
    %60 = vector.shape_cast %59 : vector<1x8x2xf32> to vector<8x2xf32>
    %61 = vector.extract_strided_slice %0 {offsets = [2, 0], sizes = [1, 64], strides = [1, 1]} : vector<3x64xf32> to vector<1x64xf32>
    %62 = vector.extract_strided_slice %60 {offsets = [0, 0], sizes = [8, 1], strides = [1, 1]} : vector<8x2xf32> to vector<8x1xf32>
    %63 = vector.extract_strided_slice %0 {offsets = [0, 0], sizes = [1, 64], strides = [1, 1]} : vector<3x64xf32> to vector<1x64xf32>
    %64 = vector.broadcast %62 : vector<8x1xf32> to vector<8x64xf32>
    %65 = vector.broadcast %63 : vector<1x64xf32> to vector<8x64xf32>
    %66 = arith.mulf %64, %65 : vector<8x64xf32>
    %67 = vector.broadcast %61 : vector<1x64xf32> to vector<8x64xf32>
    %68 = arith.addf %67, %66 : vector<8x64xf32>
    %69 = vector.extract_strided_slice %60 {offsets = [0, 1], sizes = [8, 1], strides = [1, 1]} : vector<8x2xf32> to vector<8x1xf32>
    %70 = vector.extract_strided_slice %0 {offsets = [1, 0], sizes = [1, 64], strides = [1, 1]} : vector<3x64xf32> to vector<1x64xf32>
    %71 = vector.broadcast %69 : vector<8x1xf32> to vector<8x64xf32>
    %72 = vector.broadcast %70 : vector<1x64xf32> to vector<8x64xf32>
    %73 = arith.mulf %71, %72 : vector<8x64xf32>
    %74 = arith.addf %68, %73 : vector<8x64xf32>
    %cst_13 = arith.constant 0.000000e+00 : f32
    %75 = vector.broadcast %cst_13 : f32 to vector<8x64xf32>
    %76 = arith.maximumf %74, %75 : vector<8x64xf32>
    %77 = arith.addf %58, %76 : vector<8x64xf32>
    %c0_14 = arith.constant 0 : index
    %c0_15 = arith.constant 0 : index
    %78 = vector.load %arg2[%c0_14, %c0_15] : memref<8x2xf32, #tpu.memory_space<vmem>>, vector<8x2xf32>
    %c0_16 = arith.constant 0 : index
    %c0_17 = arith.constant 0 : index
    %79 = vector.load %arg4[%c0_16, %c0_17] : memref<3x64xf32, #tpu.memory_space<vmem>>, vector<3x64xf32>
    %80 = vector.extract_strided_slice %79 {offsets = [2, 0], sizes = [1, 64], strides = [1, 1]} : vector<3x64xf32> to vector<1x64xf32>
    %81 = vector.extract_strided_slice %78 {offsets = [0, 0], sizes = [8, 1], strides = [1, 1]} : vector<8x2xf32> to vector<8x1xf32>
    %82 = vector.extract_strided_slice %79 {offsets = [0, 0], sizes = [1, 64], strides = [1, 1]} : vector<3x64xf32> to vector<1x64xf32>
    %83 = vector.broadcast %81 : vector<8x1xf32> to vector<8x64xf32>
    %84 = vector.broadcast %82 : vector<1x64xf32> to vector<8x64xf32>
    %85 = arith.mulf %83, %84 : vector<8x64xf32>
    %86 = vector.broadcast %80 : vector<1x64xf32> to vector<8x64xf32>
    %87 = arith.addf %86, %85 : vector<8x64xf32>
    %88 = vector.extract_strided_slice %78 {offsets = [0, 1], sizes = [8, 1], strides = [1, 1]} : vector<8x2xf32> to vector<8x1xf32>
    %89 = vector.extract_strided_slice %79 {offsets = [1, 0], sizes = [1, 64], strides = [1, 1]} : vector<3x64xf32> to vector<1x64xf32>
    %90 = vector.broadcast %88 : vector<8x1xf32> to vector<8x64xf32>
    %91 = vector.broadcast %89 : vector<1x64xf32> to vector<8x64xf32>
    %92 = arith.mulf %90, %91 : vector<8x64xf32>
    %93 = arith.addf %87, %92 : vector<8x64xf32>
    %cst_18 = arith.constant 0.000000e+00 : f32
    %94 = vector.broadcast %cst_18 : f32 to vector<8x64xf32>
    %95 = arith.maximumf %93, %94 : vector<8x64xf32>
    %96 = tpu.concatenate %77, %95 in 1 : vector<8x64xf32>, vector<8x64xf32> -> vector<8x128xf32>
    %c0_19 = arith.constant 0 : index
    %c0_20 = arith.constant 0 : index
    %97 = vector.load %arg5[%c0_19, %c0_20] : memref<129x64xbf16, #tpu.memory_space<vmem>>, vector<129x64xbf16>
    %98 = vector.extract_strided_slice %97 {offsets = [0, 0], sizes = [128, 64], strides = [1, 1]} : vector<129x64xbf16> to vector<128x64xbf16>
    %99 = vector.extract_strided_slice %97 {offsets = [128, 0], sizes = [1, 64], strides = [1, 1]} : vector<129x64xbf16> to vector<1x64xbf16>
    %100 = arith.extf %99 : vector<1x64xbf16> to vector<1x64xf32>
    %101 = arith.truncf %96 : vector<8x128xf32> to vector<8x128xbf16>
    %cst_21 = arith.constant dense<0.000000e+00> : vector<8x64xf32>
    %102 = tpu.matmul %101, %98, %cst_21 {dimension_numbers = #tpu.dot_dimension_numbers<[1], [0], [0], [1], [0, 0, 1, 1], [], []>} : vector<8x128xbf16>, vector<128x64xbf16>, vector<8x64xf32> -> vector<8x64xf32>
    %103 = vector.broadcast %100 : vector<1x64xf32> to vector<8x64xf32>
    %104 = arith.addf %102, %103 : vector<8x64xf32>
    %cst_22 = arith.constant 0.000000e+00 : f32
    %105 = vector.broadcast %cst_22 : f32 to vector<8x64xf32>
    %106 = arith.maximumf %104, %105 : vector<8x64xf32>
    %107 = vector.extract_strided_slice %106 {offsets = [0, 0], sizes = [8, 32], strides = [1, 1]} : vector<8x64xf32> to vector<8x32xf32>
    %108 = vector.extract_strided_slice %106 {offsets = [0, 32], sizes = [8, 32], strides = [1, 1]} : vector<8x64xf32> to vector<8x32xf32>
    %109 = arith.addf %107, %108 : vector<8x32xf32>
    %c0_23 = arith.constant 0 : index
    %c0_24 = arith.constant 0 : index
    %110 = vector.load %arg6[%c0_23, %c0_24] : memref<8x32xf32, #tpu.memory_space<vmem>>, vector<8x32xf32>
    tpu.vector_store %arg6[%c0_23, %c0_24], %109 {strides = array<i32>} : memref<8x32xf32, #tpu.memory_space<vmem>>, vector<8x32xf32>,
    return
  }
  func.func @transform_0(%arg0: i32) -> (i32, i32, i32) {
    %c0_i32 = arith.constant 0 : i32
    %c0_i32_0 = arith.constant 0 : i32
    %c0_i32_1 = arith.constant 0 : i32
    return %c0_i32, %arg0, %c0_i32_0 : i32, i32, i32
  }
  func.func @transform_1(%arg0: i32) -> (i32, i32) {
    %c0_i32 = arith.constant 0 : i32
    %c0_i32_0 = arith.constant 0 : i32
    return %arg0, %c0_i32 : i32, i32
  }
  func.func @transform_2(%arg0: i32) -> (i32, i32) {
    %c0_i32 = arith.constant 0 : i32
    %c0_i32_0 = arith.constant 0 : i32
    %c0_i32_1 = arith.constant 0 : i32
    return %c0_i32, %c0_i32_0 : i32, i32
  }
  func.func @transform_3(%arg0: i32) -> (i32, i32) {
    %c0_i32 = arith.constant 0 : i32
    %c0_i32_0 = arith.constant 0 : i32
    %c0_i32_1 = arith.constant 0 : i32
    return %c0_i32, %c0_i32_0 : i32, i32
  }
  func.func @transform_4(%arg0: i32) -> (i32, i32) {
    %c0_i32 = arith.constant 0 : i32
    %c0_i32_0 = arith.constant 0 : i32
    %c0_i32_1 = arith.constant 0 : i32
    return %c0_i32, %c0_i32_0 : i32, i32
  }
  func.func @transform_5(%arg0: i32) -> (i32, i32) {
    %c0_i32 = arith.constant 0 : i32
    %c0_i32_0 = arith.constant 0 : i32
    return %arg0, %c0_i32 : i32, i32
  }
}

</mosaic_0001>

<bundles_post_ra>
// kernel: tpu_custom_call.1
= control target key start
LH: loop header
LB: loop body
LE: loop exit
PB: predicated region body
PF: predicated region fallthrough
CT: control target
= control target key end

     0   :  { %10 = vsyncpa [#allocation4], 0  ;;  %s902_s0 = inlined_call_operand.vmem [shape: f32[4,16,2], index: 0, kind: input, shape index: {}]   ;;  %s903_s1 = inlined_call_operand.vmem [shape: f32[16,2], index: 1, kind: input, shape index: {}]   ;;  %s904_s2 = inlined_call_operand.vmem [shape: f32[3,64], index: 2, kind: input, shape index: {}]   ;;  %s905_s3 = inlined_call_operand.vmem [shape: f32[3,64], index: 3, kind: input, shape index: {}]   ;;  %s906_s4 = inlined_call_operand.vmem [shape: bf16[129,64], index: 4, kind: input, shape index: {}]   ;;  %s907_s5 = inlined_call_operand.hbm [shape: f32[16,32], index: 5, kind: output, shape index: {}]  }
   0x1   :  { %12 = vsyncpa [#allocation4 + $0x1], 0  ;;  %s769_s18 = smov 0   ;;  %s771_s19 = smov 0  }
   0x2   :  { %s773_s20 = smov 0   ;;  %s775_s21 = smov 0  }
   0x3 LB: > { %s790_s22 = sadd.s32 4294967295, %s733_s21   ;;  %s565_s23 = sadd.s32 4294967294, %s733_s21   ;;  %s733_s21 = sphi %s775_s21, %s913_s21   ;;  %s729_s20 = sphi %s773_s20, %s912_s20   ;;  %s725_s19 = sphi %s771_s19, %s911_s19   ;;  %s721_s18 = sphi %s769_s18, %s910_s18  }
   0x4   : > { %s794_s24 = sadd.s32 1, %s733_s21   ;;  %s25_s25 = sadd.s32 1, %s729_s20 }
   0x5   : > { %s22_s26 = ssub.s32 %s733_s21, %s794_s24  ;;  %p32_p0 = scmp.ne.s32.totalorder %s729_s20, %s725_s19 }
   0x6   : > { %p23_p1 = scmp.eq.s32.totalorder %s22_s26, 0  ;;  %p33_p2 = scmp.eq.s32.totalorder %s733_s21, 0 }
   0x7   : > { %p151_p3 = scmp.eq.s32.totalorder %s790_s22, 1  ;;  %p156_p4 = scmp.ne.s32.totalorder %s725_s19, %s721_s18 }
   0x8   : > { %s806_s27 = scalar_select %p23_p1, %s729_s20, %s25_s25  }
   0x9   : > { %p34_p5 = por %p33_p2, %p32_p0  ;;  %p808_p6 = por %p151_p3, %p32_p0 }
   0xa   : > { %p157_p7 = scmp.eq.s32.totalorder %s565_s23, 1  ;;  %p567_p9 = scmp.ge.s32.totalorder %s733_s21, 2 }
   0xc   : > { %p812_p8 = por %p157_p7, %p156_p4  ;;  %182 = sbr.rel (%p567_p9) target bundleno = 25 (0x19), region = 28 }
  0x11   : > { %185 = sbr.rel (!%p34_p5) target bundleno = 25 (0x19), region = 32  ;;  %s187_s30 = sand.u32 (%p34_p5), 1, %s729_s20  }
  0x12   : > { %s569_s6 = sshll.u32 (%p34_p5), %s733_s21, 3  ;;  %s568_s7 = sshll.u32 (%p34_p5), %s187_s30, 5 }
  0x13   : > { %s191_s10 = scalar_lea.vmem (%p34_p5), %s902_s0, %s569_s6  ;;  %s189_s11 = scalar_lea.vmem (%p34_p5), [#allocation2], %s568_s7 }
  0x14   : > { %v226_v0 = vld [vmem:[%s191_s10] sm:$0xff] (%p34_p5)  ;;  %v228_v1 = vld [vmem:[%s191_s10 + $0x10] sm:$0xff] (%p34_p5) }
  0x15   : > { %v230_v2 = vld [vmem:[%s191_s10 + $0x20] sm:$0xff] (%p34_p5)  ;;  %227 = vst [vmem:[%s189_s11] sm:$0xff] (%p34_p5), %v226_v0  ;;  %v232_v3 = vld [vmem:[%s191_s10 + $0x30] sm:$0xff] (%p34_p5) }
  0x16   : > { %229 = vst [vmem:[%s189_s11 + $0x8] sm:$0xff] %v228_v1 }
  0x17   : > { %231 = vst [vmem:[%s189_s11 + $0x10] sm:$0xff] %v230_v2 }
  0x18   : > { %233 = vst [vmem:[%s189_s11 + $0x18] sm:$0xff] %v232_v3 }
  0x19 PF: > { %p570_p10 = scmp.ge.s32.totalorder %s733_s21, 1  ;;  %p245_p11 = scmp.lt.s32.totalorder %s733_s21, 3 }
  0x1b   : > { %p246_p12 = pnand %p570_p10, %p245_p11 }
  0x1c   : > { %p283_p13 = scmp.lt.s32.totalorder (!%p246_p12), %s790_s22, 1  ;;  %s828_s12 = sand.u32 (!%p246_p12), 1, %s725_s19  }
  0x1d   : > { %249 = sbr.rel (%p246_p12) target bundleno = 513 (0x201), region = 74  ;;  %s571_s13 = sshll.u32 (!%p246_p12), %s828_s12, 5 }
  0x1e   : > { %s254_s16 = scalar_lea.vmem (!%p246_p12), [#allocation2], %s571_s13  ;;  %s737_s17 = smov (!%p246_p12), 64  }
  0x1f   : > { %s738_s13 = smov (!%p246_p12), 96   ;;  %s473_s6 = scalar_lea.sflag (!%p246_p12), [#allocation4], %s828_s12 }
  0x20   : > { %s691_s10 = scalar_lea.hbm (!%p246_p12), %s907_s5, 16 }
  0x22   : > { %v735_v4 = vmov 0   ;;  %s284_s14 = scalar_select %p283_p13, %s790_s22, 1  ;;  %v736_v5 = vmov 1   ;;  %v288_v6 = vld [vmem:[%s254_s16] sm:$0xff]  ;;  %v574_v8 = vld [vmem:[%s254_s16 + $0x8] sm:$0xff]  ;;  %v575_v9 = vld [vmem:[%s254_s16 + $0x10] sm:$0xff] }
  0x23   : > { %664 = vset.pattern.permute.xlu0 %v735_v4  ;;  %666 = vset.pattern.permute.xlu1 %v735_v4  ;;  %v576_v10 = vld [vmem:[%s254_s16 + $0x18] sm:$0xff]  ;;  %v359_v12 = vld [vmem:[%s905_s3] sm:$0x7]  ;;  %v619_v14 = vld [vmem:[%s906_s4 + $0x30] sm:$0xff]  ;;  %vm381_vm0 = vcmask 523264   ;;  %vm470_vm1 = vcmask 261120  }
  0x24   : > { %667 = vset.pattern.permute.xlu2 %v736_v5  ;;  %s573_s15 = sshll.u32 %s284_s14, 3  ;;  %291 = vperm.xlu1 %666, %v288_v6   ;;  %v620_v11 = vld [vmem:[%s906_s4 + $0x38] sm:$0xff]  ;;  %v365_v15 = vperm.slane %v359_v12, 0  ;;  %v618_v16 = vld [vmem:[%s906_s4 + $0x28] sm:$0xff]  ;;  %v367_v17 = vperm.slane %v359_v12, 2  ;;  %v373_v19 = vperm.slane %v359_v12, 1 }
  0x25   : > { %s286_s25 = scalar_lea.vmem %s903_s1, %s573_s15  ;;  %299 = vperm.xlu2 %667, %v288_v6   ;;  %451 = vmatpush.bf16.msra.mxu0 %v620_v11  ;;  %v617_v20 = vld [vmem:[%s906_s4 + $0x20] sm:$0xff]  ;;  %v616_v25 = vld [vmem:[%s906_s4 + $0x18] sm:$0xff]  ;;  %v615_v27 = vld [vmem:[%s906_s4 + $0x10] sm:$0xff]  ;;  %s572_s14 = sshll.u32 %s828_s12, 3 }
  0x26   : > { %v358_v7 = vld [vmem:[%s286_s25] sm:$0xff]  ;;  %v614_v28 = vld [vmem:[%s906_s4 + $0x8] sm:$0xff]  ;;  %s610_s15 = sshll.u32 %s790_s22, 3  ;;  %s282_s25 = scalar_lea.vmem [#allocation3], %s572_s14 }
  0x27   : > { %362 = vperm.xlu0 %664, %v358_v7   ;;  %v287_v32 = vld [vmem:[%s904_s2] sm:$0x7]  ;;  %s483_s23 = scalar_lea.hbm %s907_s5, %s610_s15  ;;  %s485_s26 = sshll.u32 %s282_s25, 4  ;;  %s486_s26 = int_to_ptr.vmem [resolvable:$true] %s485_s26 }
  0x28   : > { %v613_v33 = vld [vmem:[%s906_s4] sm:$0xff]  ;;  %v294_v34 = vperm.slane %v287_v32, 0  ;;  %v296_v36 = vperm.slane %v287_v32, 2  ;;  %v302_v38 = vperm.slane %v287_v32, 1  ;;  %s487_s30 = sshll.u32 %s483_s23, 4  ;;  %s488_s30 = int_to_ptr.hbm [resolvable:$true] %s487_s30 }
  0x29   : > { %452 = vmatpush.bf16.msra.mxu0 %v619_v14  ;;  %s685_s7 = sshra.s32 %s488_s30, 4  ;;  %s686_s7 = int_to_ptr.hbm [resolvable:$true] %s685_s7 }
  0x2a   : > { %s687_s8 = scalar_lea.hbm %s686_s7, 8  ;;  %p692_p3 = scmp.lt.s32.totalorder %s686_s7, %s907_s5 }
  0x2b   : > { %p688_p0 = scmp.ne.s32.totalorder %s686_s7, %s687_s8  ;;  %p693_p4 = scmp.lt.s32.totalorder %s691_s10, %s687_s8 }
  0x2c   : > { %311 = vperm.xlu1 %666, %v574_v8  }
  0x2d   : > { %317 = vperm.xlu2 %667, %v574_v8   ;;  %453 = vmatpush.bf16.msra.mxu0 %v618_v16  ;;  %p689_p1 = pnand %p688_p0, %p808_p6  ;;  %p694_p5 = por %p693_p4, %p692_p3 }
  0x2f   : > { %665 = vset.pattern.permute.xlu0 %v736_v5  ;;  %p690_p2 = pneg %p689_p1 }
  0x30   : > { %370 = vperm.xlu0 %665, %v358_v7  }
  0x31   : > { %454 = vmatpush.bf16.msra.mxu0 %v617_v20  ;;  %p695_p7 = pnand %p694_p5, %p690_p2 }
  0x34   : > { %328 = vperm.xlu1 %666, %v575_v9  }
  0x35   : > { %334 = vperm.xlu2 %667, %v575_v9   ;;  %455 = vmatpush.bf16.msra.mxu0 %v616_v25 }
  0x38   : > { %668 = vset.pattern.permute.xlu0 %v735_v4  ;;  %v399_v4 = vld [vmem:[%s906_s4 + $0x40] sm:$0x1] }
  0x39   : > { %345 = vperm.xlu0 %668, %v576_v10   ;;  %456 = vmatpush.bf16.msra.mxu0 %v615_v27 }
  0x3c   : > { %669 = vset.pattern.permute.xlu1 %v736_v5 }
  0x3d   : > { %351 = vperm.xlu1 %669, %v576_v10   ;;  %457 = vmatpush.bf16.msra.mxu0 %v614_v28 }
  0x41   : > { %670 = vset.pattern.permute.xlu0 %v736_v5  ;;  %458 = vmatpush.bf16.msra.mxu0 %v613_v33  ;;  %v400_v5 = vunpack.c.l.bf16 %v399_v4 }
  0x43   : > { %v402_v6 = vperm.slane %v400_v5, 0 }
  0x7f   : > { %v300_v30 = vpop.permute.xlu2 %299 }
  0x80   : > { %v303_v42 = vmul.f32 %v302_v38, %v300_v30 }
  0x87   : > { %v318_v35 = vpop.permute.xlu2 %317 }
  0x88   : > { %v320_v44 = vmul.f32 %v318_v35, %v302_v38 }
  0x8f   : > { %v335_v47 = vpop.permute.xlu2 %334 }
  0x90   : > { %v337_v52 = vmul.f32 %v335_v47, %v302_v38 }
  0x96   : > { %v292_v29 = vpop.permute.xlu1 %291 }
  0x97   : > { %v295_v37 = vmul.f32 %v294_v34, %v292_v29 }
  0x99   : > { %v363_v13 = vpop.permute.xlu0 %362  ;;  %v297_v41 = vadd.f32 %v296_v36, %v295_v37 }
  0x9a   : > { %v366_v18 = vmul.f32 %v365_v15, %v363_v13 }
  0x9b   : > { %v304_v48 = vadd.f32 %v303_v42, %v297_v41 }
  0x9c   : > { %v368_v22 = vadd.f32 %v367_v17, %v366_v18 }
  0x9d   : > { %v305_v54 = vmax.f32 %v304_v48, 0.0 }
  0x9e   : > { %v312_v31 = vpop.permute.xlu1 %311 }
  0x9f   : > { %v314_v40 = vmul.f32 %v312_v31, %v294_v34 }
  0xa1   : > { %v315_v43 = vadd.f32 %v314_v40, %v296_v36 }
  0xa2   : > { %v371_v21 = vpop.permute.xlu0 %370 }
  0xa3   : > { %v374_v23 = vmul.f32 %v373_v19, %v371_v21  ;;  %v321_v49 = vadd.f32 %v320_v44, %v315_v43 }
  0xa5   : > { %v375_v24 = vadd.f32 %v374_v23, %v368_v22  ;;  %v322_v55 = vmax.f32 %v321_v49, 0.0 }
  0xa6   : > { %v329_v39 = vpop.permute.xlu1 %328 }
  0xa7   : > { %v376_v26 = vmax.f32 %v375_v24, 0.0  ;;  %v331_v45 = vmul.f32 %v329_v39, %v294_v34  ;;  %v323_v59 = vadd.f32 %v322_v55, %v305_v54 }
  0xa9   : > { %378 = vrot.lane.b32.xlu2 %v376_v26, %s737_s17  ;;  %v332_v50 = vadd.f32 %v331_v45, %v296_v36 }
  0xab   : > { %v346_v46 = vpop.permute.xlu0 %345  ;;  %v338_v57 = vadd.f32 %v337_v52, %v332_v50 }
  0xac   : > { %v348_v51 = vmul.f32 %v346_v46, %v294_v34 }
  0xad   : > { %v339_v60 = vmax.f32 %v338_v57, 0.0 }
  0xae   : > { %v349_v56 = vadd.f32 %v348_v51, %v296_v36 }
  0xaf   : > { %v352_v53 = vpop.permute.xlu1 %351  ;;  %v340_v62 = vadd.f32 %v339_v60, %v323_v59 }
  0xb0   : > { %v354_v58 = vmul.f32 %v352_v53, %v302_v38 }
  0xb2   : > { %v355_v61 = vadd.f32 %v354_v58, %v349_v56 }
  0xb4   : > { %v356_v63 = vmax.f32 %v355_v61, 0.0 }
  0xb6   : > { %v357_v0 = vadd.f32 %v356_v63, %v340_v62 }
 0x103   : > { %v379_v1 = vpop.permute.xlu2 %378 }
 0x104   : > { %v382_v2 = vsel %vm381_vm0, %v357_v0, %v379_v1 }
 0x105   : > { %v401_v3 = vpack.c.bf16 %v382_v2, %v382_v2 }
 0x107   : > { %459 = vmatmul.bf16.vlgmr.msra.gmra.mxu0 %v401_v3 }
 0x184   : > { %v460_v7 = vpop.f32.mrf.mxu0 }
 0x185   : > { %v461_v8 = vadd.f32 %v460_v7, %v402_v6 }
 0x187   : > { %v464_v9 = vmax.f32 %v461_v8, 0.0 }
 0x189   : > { %466 = vrot.lane.b32.xlu1 %v464_v9, %s738_s13 }
 0x18c   : > { %v462_v10 = vpop.f32.mrf.mxu0 }
 0x1fb   : > { %v467_v11 = vpop.permute.xlu1 %466 }
 0x1fc   : > { %v469_v12 = vadd.f32 %v467_v11, %v464_v9 }
 0x1fe   : > { %471 = vst.msk [vmem:[%s282_s25] sm:$0xff] %vm470_vm1, %v469_v12 }
 0x1ff   : > { %698 = shalt.err (!%p695_p7)
}
 0x200   : > { %621 = dma.vmem_to_hbm [thread:$0]  (%p808_p6), %s486_s26, 128, %s488_s30, %s473_s6  }
 0x201 PF: > { %s499_s12 = sand.u32 1, %s721_s18   ;;  %p624_p10 = pnand %p567_p9, %p812_p8 }
 0x202   : > { %s500_s14 = scalar_lea.sflag [#allocation4], %s499_s12 }
 0x203   : > { %p625_p11 = pneg %p624_p10 }
 0x205   : > { %716 = dma.done.wait (%p625_p11), %s500_s14, 128  }
 0x206   : > { %718 = vsyncadd (%p625_p11), %s500_s14, 4294967168  ;;  %p15_p12 = scmp.ge.s32.totalorder %s794_s24, 4   ;;  %s910_s18 = smov %s725_s19 }
 0x207   : > { %s911_s19 = smov %s729_s20  ;;  %s912_s20 = smov %s806_s27 }
 0x208   : > { %s913_s21 = smov %s794_s24  ;;  %17 = sbr.rel (!%p15_p12) target bundleno = 3 (0x3), region = 124 }
 0x20d   :  { %506 = vsyncpa [#allocation4], 1 }
 0x20e   :  { %508 = vsyncpa [#allocation4 + $0x1], 1 }

</bundles_post_ra>
